<compile_context>
chip_gen: v6e
topology: v6e:2x2x1
jax: 0.10.0
libtpu: 0.0.40
codegen_flags: <defaults>
</compile_context>

<pallas_src>
import functools

import jax
import jax.numpy as jnp
from jax.experimental import pallas as pl
from jax.experimental.pallas import tpu as pltpu


def _label_smoothing_kernel(pred_ref, label_ref, out_ref, *,
                            n_actual, tile_n, blocks_per_split,
                            confidence, smooth_off):
    # pred_ref : (C, tile_n)  input dtype, VMEM (classes on sublanes, batch on lanes)
    # label_ref: (1, tile_n)  int32, VMEM
    # out_ref  : (1, tile_n)  f32,   VMEM -- per-split, per-lane accumulator slab
    s = pl.program_id(0)   # split (parallel axis; one per TensorCore on v7x)
    i = pl.program_id(1)   # block within split (reduction axis, accumulator carried)

    @pl.when(i == 0)
    def _():
        out_ref[...] = jnp.zeros_like(out_ref)

    logits = pred_ref[...].astype(jnp.float32)            # (C, tile_n)
    labels = label_ref[...]                               # (1, tile_n) int32
    c = logits.shape[0]

    # Numerically stable log-softmax pieces over the class (sublane) axis.
    m = jnp.max(logits, axis=0, keepdims=True)            # (1, tile_n)
    z = logits - m                                        # (C, tile_n)
    lse = jnp.log(jnp.sum(jnp.exp(z), axis=0, keepdims=True))   # (1, tile_n)

    # z at the target class, via iota/compare (no scatter, no full logp tensor).
    class_ids = jax.lax.broadcasted_iota(jnp.int32, z.shape, 0)
    z_tgt = jnp.sum(jnp.where(class_ids == labels, z, 0.0), axis=0, keepdims=True)

    # sum(true_dist * log_softmax) =
    #   (conf - off) * logp[target] + off * sum_c logp
    #   = (conf - off) * (z_tgt - lse) + off * (sum_c z - C*lse)
    contrib = (confidence - smooth_off) * (z_tgt - lse)    # (1, tile_n)
    if smooth_off != 0.0:   # compile-time fast path for smoothing == 0
        z_sum = jnp.sum(z, axis=0, keepdims=True)
        contrib = contrib + smooth_off * (z_sum - float(c) * lse)

    # Batch-padding mask only on tiles that touch / lie past the boundary.
    block_start = (s * blocks_per_split + i) * tile_n
    needs_mask = block_start + tile_n > n_actual

    @pl.when(jnp.logical_not(needs_mask))
    def _():
        out_ref[...] += contrib

    @pl.when(needs_mask)
    def _():
        col = jax.lax.broadcasted_iota(jnp.int32, (1, tile_n), 1) + block_start
        out_ref[...] += jnp.where(col < n_actual, contrib, 0.0)


def _pick_tile(n, c, tile_n, itemsize):
    """Largest multiple-of-128 lane tile that keeps double-buffered VMEM ~<12 MiB."""
    c_pad = pl.cdiv(c, 8) * 8
    bytes_per_col = 2 * (c_pad * itemsize + 8 * 4 + 8 * 4)  # logits + labels + out, x2 buffers
    cap = max(128, ((12 * 1024 * 1024) // bytes_per_col) // 128 * 128)
    tn = min(int(tile_n), cap, pl.cdiv(n, 128) * 128)
    return max(128, pl.cdiv(tn, 128) * 128)


def label_smoothing_loss(pred: jax.Array, target: jax.Array, *,
                         classes: int | None = None, smoothing: float = 0.0,
                         tile_n: int = 32768, num_splits: int = 2,
                         pred_class_major: bool = False) -> jax.Array:
    """Pallas TPU equivalent of LabelSmoothingLoss.forward. Returns scalar f32.

    pred: (N, C) logits (or (C, N) if pred_class_major=True); target: (N,) int labels.
    """
    if pred_class_major:
        c, n = pred.shape
    else:
        n, c = pred.shape
    assert target.shape == (n,)
    classes = c if classes is None else classes

    confidence = 1.0 - float(smoothing)
    smooth_off = float(smoothing) / (classes - 1) if classes > 1 else 0.0

    # Lane-axis tile, block/split bookkeeping.
    tn = _pick_tile(n, c, tile_n, pred.dtype.itemsize)
    n_blocks = pl.cdiv(n, tn)
    splits = max(1, min(int(num_splits), n_blocks))
    bps = pl.cdiv(n_blocks, splits)          # blocks per split
    n_pad = splits * bps * tn

    # Layout plumbing (kept in input dtype; pad+transpose fuse into one XLA op).
    pred_t = pred if pred_class_major else pred.T          # (C, N)
    if n_pad != n:
        pred_t = jnp.pad(pred_t, ((0, 0), (0, n_pad - n)))
    labels = target.astype(jnp.int32).reshape(1, n)
    if n_pad != n:
        labels = jnp.pad(labels, ((0, 0), (0, n_pad - n)))

    kernel = functools.partial(
        _label_smoothing_kernel,
        n_actual=n, tile_n=tn, blocks_per_split=bps,
        confidence=confidence, smooth_off=smooth_off)

    partial_sums = pl.pallas_call(
        kernel,
        out_shape=jax.ShapeDtypeStruct((1, splits * tn), jnp.float32),
        grid_spec=pltpu.PrefetchScalarGridSpec(
            num_scalar_prefetch=0,
            grid=(splits, bps),
            in_specs=[
                pl.BlockSpec((c, tn), lambda s, i: (0, s * bps + i)),  # logits tile
                pl.BlockSpec((1, tn), lambda s, i: (0, s * bps + i)),  # labels tile
            ],
            out_specs=pl.BlockSpec((1, tn), lambda s, i: (0, s)),      # per-split acc slab
        ),
        compiler_params=pltpu.CompilerParams(
            dimension_semantics=("parallel", "arbitrary")),
    )(pred_t, labels)

    # Combine / negate / mean in the wrapper (tiny XLA reduction).
    return -jnp.sum(partial_sums) / jnp.float32(n)


def _label_smoothing_ref(pred, target, classes, smoothing):
    # Pure-JAX reference mirroring the PyTorch module.
    logp = jax.nn.log_softmax(pred.astype(jnp.float32), axis=-1)
    n, c = pred.shape
    confidence = 1.0 - smoothing
    off = smoothing / (classes - 1) if classes > 1 else 0.0
    true_dist = jnp.full((n, c), off, dtype=jnp.float32)
    true_dist = true_dist.at[jnp.arange(n), target].set(confidence)
    return jnp.mean(jnp.sum(-true_dist * logp, axis=-1))


if __name__ == "__main__":
    key = jax.random.PRNGKey(0)
    k1, k2, k3, k4, k5, k6 = jax.random.split(key, 6)

    # Case 1: module defaults (classes=3, smoothing=0.0), tiny batch, single tile.
    N1, C1 = 8, 3
    pred1 = jax.random.normal(k1, (N1, C1), dtype=jnp.float32)
    tgt1 = jax.random.randint(k2, (N1,), 0, C1, dtype=jnp.int32)
    loss1 = label_smoothing_loss(pred1, tgt1, smoothing=0.0)
    ref1 = _label_smoothing_ref(pred1, tgt1, C1, 0.0)

    # Case 2: smoothing=0.1, two splits with one block each, boundary masking.
    N2, C2 = 200, 3
    pred2 = jax.random.normal(k3, (N2, C2), dtype=jnp.float32)
    tgt2 = jax.random.randint(k4, (N2,), 0, C2, dtype=jnp.int32)
    loss2 = label_smoothing_loss(pred2, tgt2, smoothing=0.1, tile_n=128)
    ref2 = _label_smoothing_ref(pred2, tgt2, C2, 0.1)

    # Case 3: bf16 logits, 2 splits x 2 blocks, partial + fully-padded tail tiles.
    N3, C3 = 700, 3
    pred3 = jax.random.normal(k5, (N3, C3), dtype=jnp.bfloat16)
    tgt3 = jax.random.randint(k6, (N3,), 0, C3, dtype=jnp.int32)
    loss3 = label_smoothing_loss(pred3, tgt3, smoothing=0.1, tile_n=256, num_splits=2)
    ref3 = _label_smoothing_ref(pred3, tgt3, C3, 0.1)

    jax.block_until_ready((loss1, loss2, loss3))
    assert jnp.allclose(loss1, ref1, atol=1e-5, rtol=1e-5), (loss1, ref1)
    assert jnp.allclose(loss2, ref2, atol=1e-5, rtol=1e-5), (loss2, ref2)
    assert jnp.allclose(loss3, ref3, atol=2e-5, rtol=2e-5), (loss3, ref3)

    print("KERNEL_OK")
</pallas_src>

<mosaic_0001>
module attributes {stable_mosaic.version = 11 : i64} {
  func.func @_label_smoothing_kernel(%arg0: i32, %arg1: i32, %arg2: memref<3x128xf32, #tpu.memory_space<vmem>>, %arg3: memref<1x128xi32, #tpu.memory_space<vmem>>, %arg4: memref<1x128xf32, #tpu.memory_space<vmem>>) attributes {dimension_semantics = [#tpu.dimension_semantics<parallel>, #tpu.dimension_semantics<arbitrary>], iteration_bounds = array<i64: 1, 1>, scalar_prefetch = 0 : i64, scratch_operands = 0 : i64, tpu.core_type = #tpu.core_type<tc>, window_params = [{transform_indices = @transform_0, window_bounds = array<i64: 3, 128>}, {transform_indices = @transform_1, window_bounds = array<i64: 1, 128>}, {transform_indices = @transform_2, window_bounds = array<i64: 1, 128>}]} {
    %c0_i32 = arith.constant 0 : i32
    %0 = arith.cmpi eq, %arg1, %c0_i32 : i32
    %1 = arith.extui %0 : i1 to i32
    %c0_i32_0 = arith.constant 0 : i32
    %2 = arith.cmpi ne, %1, %c0_i32_0 : i32
    scf.if %2 {
      %cst_11 = arith.constant 0.000000e+00 : f32
      %33 = vector.broadcast %cst_11 : f32 to vector<1x128xf32>
      %c0_12 = arith.constant 0 : index
      %c0_13 = arith.constant 0 : index
      %34 = vector.load %arg4[%c0_12, %c0_13] : memref<1x128xf32, #tpu.memory_space<vmem>>, vector<1x128xf32>
      tpu.vector_store %arg4[%c0_12, %c0_13], %33 {strides = array<i32>} : memref<1x128xf32, #tpu.memory_space<vmem>>, vector<1x128xf32>,
    } else {
    }
    %c0 = arith.constant 0 : index
    %c0_1 = arith.constant 0 : index
    %3 = vector.load %arg2[%c0, %c0_1] : memref<3x128xf32, #tpu.memory_space<vmem>>, vector<3x128xf32>
    %c0_2 = arith.constant 0 : index
    %c0_3 = arith.constant 0 : index
    %4 = vector.load %arg3[%c0_2, %c0_3] : memref<1x128xi32, #tpu.memory_space<vmem>>, vector<1x128xi32>
    %cst = arith.constant dense<0xFF800000> : vector<128xf32>
    %5 = vector.multi_reduction <maximumf>, %3, %cst [0] : vector<3x128xf32> to vector<128xf32>
    %6 = vector.shape_cast %5 : vector<128xf32> to vector<1x128xf32>
    %7 = vector.broadcast %6 : vector<1x128xf32> to vector<3x128xf32>
    %8 = arith.subf %3, %7 : vector<3x128xf32>
    %9 = math.exp %8 : vector<3x128xf32>
    %cst_4 = arith.constant dense<0.000000e+00> : vector<128xf32>
    %10 = vector.multi_reduction <add>, %9, %cst_4 [0] : vector<3x128xf32> to vector<128xf32>
    %11 = vector.shape_cast %10 : vector<128xf32> to vector<1x128xf32>
    %12 = math.log %11 : vector<1x128xf32>
    %13 = tpu.iota {dimensions = array<i32: 0>} : vector<3x128xi32>
    %14 = vector.broadcast %4 : vector<1x128xi32> to vector<3x128xi32>
    %15 = arith.cmpi eq, %13, %14 : vector<3x128xi32>
    %cst_5 = arith.constant 0.000000e+00 : f32
    %16 = vector.broadcast %cst_5 : f32 to vector<3x128xf32>
    %17 = arith.select %15, %8, %16 : vector<3x128xi1>, vector<3x128xf32>
    %cst_6 = arith.constant dense<0.000000e+00> : vector<128xf32>
    %18 = vector.multi_reduction <add>, %17, %cst_6 [0] : vector<3x128xf32> to vector<128xf32>
    %19 = vector.shape_cast %18 : vector<128xf32> to vector<1x128xf32>
    %20 = arith.subf %19, %12 : vector<1x128xf32>
    %cst_7 = arith.constant 1.000000e+00 : f32
    %21 = vector.broadcast %cst_7 : f32 to vector<1x128xf32>
    %22 = arith.mulf %21, %20 : vector<1x128xf32>
    %c1_i32 = arith.constant 1 : i32
    %23 = arith.muli %arg0, %c1_i32 : i32
    %24 = arith.addi %23, %arg1 : i32
    %c128_i32 = arith.constant 128 : i32
    %25 = arith.muli %24, %c128_i32 : i32
    %c128_i32_8 = arith.constant 128 : i32
    %26 = arith.addi %25, %c128_i32_8 : i32
    %c8_i32 = arith.constant 8 : i32
    %27 = arith.cmpi sgt, %26, %c8_i32 : i32
    %true = arith.constant true
    %28 = arith.xori %27, %true : i1
    %29 = arith.extui %28 : i1 to i32
    %c0_i32_9 = arith.constant 0 : i32
    %30 = arith.cmpi ne, %29, %c0_i32_9 : i32
    scf.if %30 {
      %c0_11 = arith.constant 0 : index
      %c0_12 = arith.constant 0 : index
      %33 = vector.load %arg4[%c0_11, %c0_12] : memref<1x128xf32, #tpu.memory_space<vmem>>, vector<1x128xf32>
      %34 = arith.addf %33, %22 : vector<1x128xf32>
      %c0_13 = arith.constant 0 : index
      %c0_14 = arith.constant 0 : index
      %35 = vector.load %arg4[%c0_13, %c0_14] : memref<1x128xf32, #tpu.memory_space<vmem>>, vector<1x128xf32>
      tpu.vector_store %arg4[%c0_13, %c0_14], %34 {strides = array<i32>} : memref<1x128xf32, #tpu.memory_space<vmem>>, vector<1x128xf32>,
    } else {
    }
    %31 = arith.extui %27 : i1 to i32
    %c0_i32_10 = arith.constant 0 : i32
    %32 = arith.cmpi ne, %31, %c0_i32_10 : i32
    scf.if %32 {
      %33 = tpu.iota {dimensions = array<i32: 1>} : vector<1x128xi32>
      %34 = vector.broadcast %25 : i32 to vector<1x128xi32>
      %35 = arith.addi %33, %34 : vector<1x128xi32>
      %c0_11 = arith.constant 0 : index
      %c0_12 = arith.constant 0 : index
      %36 = vector.load %arg4[%c0_11, %c0_12] : memref<1x128xf32, #tpu.memory_space<vmem>>, vector<1x128xf32>
      %c8_i32_13 = arith.constant 8 : i32
      %37 = vector.broadcast %c8_i32_13 : i32 to vector<1x128xi32>
      %38 = arith.cmpi slt, %35, %37 : vector<1x128xi32>
      %cst_14 = arith.constant 0.000000e+00 : f32
      %39 = vector.broadcast %cst_14 : f32 to vector<1x128xf32>
      %40 = arith.select %38, %22, %39 : vector<1x128xi1>, vector<1x128xf32>
      %41 = arith.addf %36, %40 : vector<1x128xf32>
      %c0_15 = arith.constant 0 : index
      %c0_16 = arith.constant 0 : index
      %42 = vector.load %arg4[%c0_15, %c0_16] : memref<1x128xf32, #tpu.memory_space<vmem>>, vector<1x128xf32>
      tpu.vector_store %arg4[%c0_15, %c0_16], %41 {strides = array<i32>} : memref<1x128xf32, #tpu.memory_space<vmem>>, vector<1x128xf32>,
    } else {
    }
    return
  }
  func.func @transform_0(%arg0: i32, %arg1: i32) -> (i32, i32) {
    %c1_i32 = arith.constant 1 : i32
    %0 = arith.muli %arg0, %c1_i32 : i32
    %1 = arith.addi %0, %arg1 : i32
    %c0_i32 = arith.constant 0 : i32
    %c0_i32_0 = arith.constant 0 : i32
    return %c0_i32, %1 : i32, i32
  }
  func.func @transform_1(%arg0: i32, %arg1: i32) -> (i32, i32) {
    %c1_i32 = arith.constant 1 : i32
    %0 = arith.muli %arg0, %c1_i32 : i32
    %1 = arith.addi %0, %arg1 : i32
    %c0_i32 = arith.constant 0 : i32
    %c0_i32_0 = arith.constant 0 : i32
    return %c0_i32, %1 : i32, i32
  }
  func.func @transform_2(%arg0: i32, %arg1: i32) -> (i32, i32) {
    %c0_i32 = arith.constant 0 : i32
    %c0_i32_0 = arith.constant 0 : i32
    return %c0_i32, %arg0 : i32, i32
  }
}

</mosaic_0001>

<bundles_post_ra>
// kernel: tpu_custom_call.1
= control target key start
LH: loop header
LB: loop body
LE: loop exit
PB: predicated region body
PF: predicated region fallthrough
CT: control target
= control target key end

     0   :  { %7 = vsyncpa [#allocation3], 0  ;;  %s208_s0 = inlined_call_operand.hbm [shape: f32[3,128], index: 0, kind: input, shape index: {}]   ;;  %s209_s1 = inlined_call_operand.vmem [shape: s32[1,128], index: 1, kind: input, shape index: {}]   ;;  %s210_s2 = inlined_call_operand.hbm [shape: f32[1,128], index: 2, kind: output, shape index: {}]  }
   0x1   :  { %8 = vsyncpa [#allocation4], 0  ;;  %s178_s9 = smov [#allocation2]  }
   0x2   :  { %s18_s10 = sshll.u32 %s178_s9, 4  ;;  %s19_s10 = int_to_ptr.vmem [resolvable:$true] %s18_s10 }
   0x3   :  { %s142_s11 = scalar_lea.vmem %s19_s10, 64  ;;  %p147_p1 = scmp.lt.s32.totalorder %s19_s10, %s19_s10 }
   0x4   :  { %p143_p0 = scmp.ne.s32.totalorder %s19_s10, %s142_s11  ;;  %p148_p2 = scmp.lt.s32.totalorder %s142_s11, %s142_s11 }
   0x6   :  { %p149_p3 = por %p148_p2, %p147_p1 }
   0x8   :  { %p150_p4 = pnand %p149_p3, %p143_p0 }
   0xa   :  { %153 = shalt.err (!%p150_p4)
}
   0xb   :  { %21 = dma.hbm_to_vmem [thread:$0]  %s208_s0, 64, %s19_s10, [#allocation3]  }
   0xc   :  { %174 = dma.done.wait [#allocation3], 64  }
   0xd   :  { %175 = vsyncadd [#allocation3], 4294967232  ;;  %v179_v0 = vmov 0.0   ;;  %vm49_vm0 = vcmask 1042432   ;;  %v47_v1 = vld [vmem:[#allocation2] sm:$0x7]  ;;  %v69_v11 = vlaneseq }
   0xe   :  { %46 = vst [vmem:[#allocation5] sm:$0x1] %v179_v0  ;;  %v50_v2 = vsel %vm49_vm0, %v47_v1, -inf  ;;  %v126_v13 = vld [vmem:[%s209_s1] ss:$0 sm:$0xff]  ;;  %s180_s1 = smov [#allocation5]  }
   0xf   :  { %v51_v3 = vrot.slane %v50_v2, 4  ;;  %v70_v12 = vshrl.u32 %v69_v11, 7  ;;  %v100_v29 = vand.u32 127, %v69_v11  ;;  %s114_s15 = sshll.u32 %s180_s1, 4  ;;  %s115_s15 = int_to_ptr.vmem [resolvable:$true] %s114_s15 }
  0x10   :  { %s154_s16 = scalar_lea.vmem %s115_s15, 16  ;;  %s158_s17 = scalar_lea.vmem %s115_s15, 32 }
  0x11   :  { %v52_v4 = vmax.f32 %v50_v2, %v51_v3  ;;  %vm75_vm1 = vcmp.eq.s32.totalorder %v70_v12, %v126_v13  ;;  %vm104_vm2 = vcmp.lt.s32.totalorder %v100_v29, 8  ;;  %p155_p5 = scmp.ne.s32.totalorder %s115_s15, %s154_s16  ;;  %p159_p6 = scmp.lt.s32.totalorder %s115_s15, %s115_s15 }
  0x12   :  { %p160_p7 = scmp.lt.s32.totalorder %s158_s17, %s154_s16 }
  0x13   :  { %v53_v5 = vrot.slane %v52_v4, 2 }
  0x14   :  { %p161_p8 = por %p160_p7, %p159_p6 }
  0x15   :  { %v54_v6 = vmax.f32 %v52_v4, %v53_v5  ;;  %v103_v34 = vld [vmem:[#allocation5] sm:$0x1] }
  0x16   :  { %p162_p9 = pnand %p161_p8, %p155_p5 }
  0x17   :  { %v55_v7 = vrot.slane %v54_v6, 1 }
  0x19   :  { %v56_v8 = vmax.f32 %v54_v6, %v55_v7 }
  0x1b   :  { %v57_v9 = vsub.f32 %v47_v1, %v56_v8 }
  0x1d   :  { %v58_v10 = vmul.f32 1.442695, %v57_v9  ;;  %v76_v15 = vsel %vm75_vm1, %v57_v9, 0.0 }
  0x1e   :  { %v77_v18 = vsel %vm49_vm0, %v76_v15, 0.0 }
  0x1f   :  { %130 = vpow2.f32 %v58_v10  ;;  %v78_v21 = vrot.slane %v77_v18, 4 }
  0x21   :  { %v79_v24 = vadd.f32 %v78_v21, %v77_v18 }
  0x23   :  { %v80_v26 = vrot.slane %v79_v24, 2 }
  0x25   :  { %v81_v27 = vadd.f32 %v80_v26, %v79_v24 }
  0x27   :  { %v82_v28 = vrot.slane %v81_v27, 1 }
  0x29   :  { %v83_v30 = vadd.f32 %v82_v28, %v81_v27 }
  0x2c   :  { %v131_v14 = vpop.eup %130 }
  0x2d   :  { %v60_v16 = vsel %vm49_vm0, %v131_v14, 0.0 }
  0x2e   :  { %v61_v17 = vrot.slane %v60_v16, 4 }
  0x30   :  { %v62_v19 = vadd.f32 %v61_v17, %v60_v16 }
  0x32   :  { %v63_v20 = vrot.slane %v62_v19, 2 }
  0x34   :  { %v64_v22 = vadd.f32 %v63_v20, %v62_v19 }
  0x36   :  { %v65_v23 = vrot.slane %v64_v22, 1 }
  0x38   :  { %v66_v25 = vadd.f32 %v65_v23, %v64_v22 }
  0x3a   :  { %132 = vlog2.f32 %v66_v25 }
  0x47   :  { %v133_v31 = vpop.eup %132 }
  0x48   :  { %v68_v32 = vmul.f32 0.6931472, %v133_v31 }
  0x4a   :  { %v84_v33 = vsub.f32 %v83_v30, %v68_v32 }
  0x4c   :  { %v105_v35 = vsel %vm104_vm2, %v84_v33, 0.0 }
  0x4d   :  { %v106_v36 = vadd.f32 %v105_v35, %v103_v34 }
  0x4f   :  { %107 = vst [vmem:[#allocation5] sm:$0x1] %v106_v36 }
  0x50   :  { %165 = shalt.err (!%p162_p9)
}
  0x51   :  { %117 = dma.vmem_to_hbm [thread:$0]  %s115_s15, 16, %s210_s2, [#allocation4]  }
  0x52   :  { %176 = dma.done.wait [#allocation4], 16  }
  0x53   :  { %177 = vsyncadd [#allocation4], 4294967280 }
  0x54   :  { %121 = vsyncpa [#allocation3], 1 }
  0x55   :  { %122 = vsyncpa [#allocation4], 1 }

</bundles_post_ra>
